<compile_context>
chip_gen: v7x
topology: tpu7x:2x2x1
jax: 0.10.0
libtpu: 0.0.40
codegen_flags: <defaults>
</compile_context>

<pallas_src>
import jax
import jax.numpy as jnp
from jax.experimental import pallas as pl
from jax.experimental.pallas import tpu as pltpu


def _hbm_copy_kernel(x_hbm, o_hbm, sem):
    # Whole-array HBM -> HBM DMA; no VMEM staging, no compute.
    cp = pltpu.make_async_copy(x_hbm, o_hbm, sem)
    cp.start()
    cp.wait()


def _explicit_copy(x):
    """Materialize a fresh copy of `x` via a direct HBM->HBM DMA."""
    nbytes = x.size * jnp.dtype(x.dtype).itemsize
    return pl.pallas_call(
        _hbm_copy_kernel,
        out_shape=jax.ShapeDtypeStruct(x.shape, x.dtype),
        in_specs=[pl.BlockSpec(memory_space=pl.ANY)],
        out_specs=pl.BlockSpec(memory_space=pl.ANY),
        scratch_shapes=[pltpu.SemaphoreType.DMA(())],
        cost_estimate=pl.CostEstimate(
            flops=0, transcendentals=0, bytes_accessed=2 * nbytes
        ),
    )(x)


def dummy_body_forward(x, remember_step=True, *, force_copy=False, donate=False):
    """Identity forward pass of DummyBody.

    `remember_step` is accepted for API parity with the PyTorch module and is
    ignored (the module captures no state).

    Default (and `donate=True`): true short-circuit — returns `x` directly,
    no kernel, no HBM traffic.  `force_copy=True`: run the explicit Pallas
    HBM->HBM DMA copy kernel and return a freshly materialized buffer.
    """
    if not force_copy or donate:
        # Identity (and "in-place" identity) are free: just hand back x.
        return x
    return _explicit_copy(x)


class DummyBodyPallas:
    """Mirror of the PyTorch DummyBody module (no parameters, no state)."""

    def __init__(self, state_dim):
        self.feature_dim = state_dim

    def __call__(self, x, remember_step=True, **kwargs):
        return dummy_body_forward(x, remember_step, **kwargs)


if __name__ == "__main__":
    key = jax.random.PRNGKey(0)
    batch, state_dim = 2, 32
    x = jax.random.normal(key, (batch, state_dim), dtype=jnp.float32)

    body = DummyBodyPallas(state_dim)

    # Default path: zero-cost identity (no kernel launch).
    out_fast = jax.block_until_ready(body(x))
    assert out_fast.shape == x.shape and out_fast.dtype == x.dtype
    assert bool(jnp.all(out_fast == x))

    # Explicit-copy path: single HBM->HBM DMA Pallas kernel.
    out_copy = jax.block_until_ready(body(x, force_copy=True))
    assert out_copy.shape == x.shape and out_copy.dtype == x.dtype
    assert bool(jnp.all(out_copy == x))

    print("KERNEL_OK")
</pallas_src>

<mosaic_0001>
module attributes {stable_mosaic.version = 11 : i64} {
  func.func @_hbm_copy_kernel(%arg0: memref<2x32xf32, #tpu.memory_space<any>>, %arg1: memref<2x32xf32, #tpu.memory_space<any>>, %arg2: memref<!tpu.dma_semaphore, #tpu.memory_space<semaphore_mem>>) attributes {dimension_semantics = [], scalar_prefetch = 0 : i64, scratch_operands = 1 : i64, tpu.core_type = #tpu.core_type<tc>} {
    tpu.enqueue_dma source(%arg0 : memref<2x32xf32, #tpu.memory_space<any>>) target(%arg1 : memref<2x32xf32, #tpu.memory_space<any>>) target_semaphore(%arg2 : memref<!tpu.dma_semaphore, #tpu.memory_space<semaphore_mem>>)
    tpu.wait_dma2 semaphore(%arg2 : memref<!tpu.dma_semaphore, #tpu.memory_space<semaphore_mem>>) src(%arg0 : memref<2x32xf32, #tpu.memory_space<any>>) dst(%arg1 : memref<2x32xf32, #tpu.memory_space<any>>)
    return
  }
}

</mosaic_0001>

<bundles_post_ra>
// kernel: tpu_custom_call.1
= control target key start
LH: loop header
LB: loop body
LE: loop exit
PB: predicated region body
PF: predicated region fallthrough
CT: control target
= control target key end

     0   :  { %s34_s6 = smov [#allocation2]   ;;  %s35_s7 = smov [#allocation3]   ;;  %s53_s0 = inlined_call_operand.hbm [shape: f32[2,32], index: 0, kind: input, shape index: {}]   ;;  %s54_s1 = inlined_call_operand.hbm [shape: f32[2,32], index: 1, kind: output, shape index: {}]  }
   0x1   :  { %s36_s8 = smov 0  }
   0x2   :  { %18 = dma.general %s53_s0, 32, %s54_s1, %s34_s6, %s35_s7, [#allocation4], %s36_s8, 0  }
   0x3   :  { %32 = dma.done.wait [#allocation2], 32 }
   0x4   :  { %33 = vsyncadd [#allocation2], 4294967264 }
   0x5   :  { %22 = vsyncmov [#allocation2] }
   0x8   :  { %s23_s13 = vpop.sfrf %22 }
   0x9   :  { %p28_p0 = scmp.ne.s32.totalorder %s23_s13, 0 }
   0xb   :  { %27 = shalt.err (%p28_p0)  }

</bundles_post_ra>
